<compile_context>
chip_gen: v5e
topology: v5e:2x2
jax: 0.10.0
libtpu: 0.0.40
codegen_flags: <defaults>
</compile_context>

<pallas_src>
import jax
import jax.numpy as jnp
from jax.experimental import pallas as pl
from jax.experimental.pallas import tpu as pltpu


def _round_up(x, m):
    return (x + m - 1) // m * m


# ---------------------------------------------------------------------------
# Pin pltpu.roll's rotation direction once (cached).  np.roll convention means
# roll(x, s)[i] == x[(i - s) % N].
# ---------------------------------------------------------------------------
_ROLL_IS_NUMPY = None


def _roll_is_numpy_convention():
    global _ROLL_IS_NUMPY
    if _ROLL_IS_NUMPY is None:
        def probe(x_ref, o_ref):
            o_ref[...] = pltpu.roll(x_ref[...], 1, axis=1)

        x = jnp.broadcast_to(jnp.arange(128, dtype=jnp.int32), (8, 128))
        rolled = pl.pallas_call(
            probe, out_shape=jax.ShapeDtypeStruct((8, 128), jnp.int32))(x)
        _ROLL_IS_NUMPY = bool(int(rolled[0, 0]) == 127)
    return _ROLL_IS_NUMPY


# ---------------------------------------------------------------------------
# Kernel: fused content/style bitonic sorts + reverse swap replay.
# ---------------------------------------------------------------------------
def _make_efdm_kernel(np_roll):
    def kernel(c_ref, s_ref, o_ref):
        key_c = c_ref[...].astype(jnp.float32)     # (R, N) content keys
        key_s = s_ref[...].astype(jnp.float32)     # (R, N) style keys
        R, N = key_c.shape

        ii = jax.lax.broadcasted_iota(jnp.int32, (R, N), 1)   # lane index

        def partner(arr, j, sel_plus):
            # value at lane i ^ j.  Under np.roll convention roll(arr, N-j)
            # yields arr[i+j] and roll(arr, j) yields arr[i-j]; sel_plus picks
            # the +j candidate for the lanes whose partner is i+j.
            up = pltpu.roll(arr, N - j, axis=1)
            dn = pltpu.roll(arr, j, axis=1)
            return jnp.where(sel_plus, up, dn)

        # Stage schedule of the bitonic sorting network (fully unrolled).
        stages = []
        k = 2
        while k <= N:
            j = k // 2
            while j >= 1:
                stages.append((k, j))
                j //= 2
            k *= 2
        T = len(stages)
        BITS = 31                                   # bits used per int32 word
        packed = [jnp.zeros((R, N), jnp.int32)
                  for _ in range((T + BITS - 1) // BITS)]

        # ---- forward: sort content (recording swaps) and style (values only)
        for t, (k, j) in enumerate(stages):
            low = (ii & j) == 0                     # lane is low element of its pair
            sel_plus = low if np_roll else jnp.logical_not(low)
            keep_min = low == ((ii & k) == 0)       # this lane keeps the smaller value

            # content compare-exchange; tie rule keeps the swap mask symmetric
            # within every pair so the recorded permutation stays valid.
            pc = partner(key_c, j, sel_plus)
            p_first = (pc < key_c) | ((pc == key_c) & jnp.logical_not(low))
            swap = keep_min == p_first              # "take partner's value"
            key_c = jnp.where(swap, pc, key_c)
            w, b = divmod(t, BITS)
            packed[w] = packed[w] | jnp.where(swap, jnp.int32(1 << b),
                                              jnp.int32(0))

            # style compare-exchange (plain value sort, nothing recorded).
            ps = partner(key_s, j, sel_plus)
            take_s = keep_min == (ps < key_s)
            key_s = jnp.where(take_s, ps, key_s)

        # ---- replay recorded content swaps in reverse order on sorted style:
        # each compare-exchange is its own inverse, so this applies the inverse
        # of the content-sorting permutation, i.e. the argsort/gather step.
        g = key_s
        for t in range(T - 1, -1, -1):
            _, j = stages[t]
            low = (ii & j) == 0
            sel_plus = low if np_roll else jnp.logical_not(low)
            w, b = divmod(t, BITS)
            swap = (packed[w] & jnp.int32(1 << b)) != 0
            g = jnp.where(swap, partner(g, j, sel_plus), g)

        # Forward value of: content + (gathered - content).detach()
        c = c_ref[...].astype(jnp.float32)
        o_ref[...] = (c + (g - c)).astype(o_ref.dtype)

    return kernel


# ---------------------------------------------------------------------------
# Block sizing from vreg pressure (not VMEM bytes).
# ---------------------------------------------------------------------------
def _choose_rows_per_block(bc, n_pad):
    lane_tiles = max(1, n_pad // 128)
    # ~10 live (rows, n_pad) f32-wide arrays inside the kernel; keep them
    # within ~48 of the 64 vregs:  10 * (rows/8) * lane_tiles <= 48.
    cap = max(8, ((48 * 8) // (10 * lane_tiles)) // 8 * 8)
    rows = min(cap, _round_up(bc, 8))
    # Prefer >= 2 grid steps when there is enough work (keeps both v7x
    # TensorCores busy on the "parallel" axis).
    if bc <= rows and bc >= 16:
        rows = max(8, (_round_up(bc, 8) // 2) // 8 * 8)
    return rows


# ---------------------------------------------------------------------------
# Wrapper around pallas_call (+ padding).
# ---------------------------------------------------------------------------
def _efdm_pallas(content_flat, style_flat):
    bc, n = content_flat.shape
    assert style_flat.shape == (bc, n)
    dtype = content_flat.dtype

    # Lane padding to a power of two >= 128 (bitonic network width); pad with
    # +inf so pad lanes sort strictly after every finite activation.
    # TODO(synk): for n not already a multiple of 128 the pad/slice could be
    # fused into the kernel (full-extent blocks + in-register inf tail) to
    # avoid the padded HBM round trip; a no-op for the shapes used here.
    n_pad = max(128, 1 << (max(n, 1) - 1).bit_length())
    rows = _choose_rows_per_block(bc, n_pad)
    bc_pad = _round_up(bc, rows)

    pad_rows = bc_pad - bc
    pad_lanes = n_pad - n
    if pad_rows or pad_lanes:
        content_flat = jnp.pad(content_flat, ((0, pad_rows), (0, pad_lanes)),
                               constant_values=jnp.inf)
        style_flat = jnp.pad(style_flat, ((0, pad_rows), (0, pad_lanes)),
                             constant_values=jnp.inf)

    grid = (bc_pad // rows,)
    spec = pl.BlockSpec((rows, n_pad), lambda i: (i, 0))

    # Actual need is tiny (2 in + 1 out blocks, double buffered) -> a few MiB
    # with generous headroom for compiler scratch / incidental spills.
    block_bytes = rows * n_pad * 4
    vmem_limit = int(min(64 << 20, max(4 << 20, 32 * block_bytes)))

    kernel = _make_efdm_kernel(_roll_is_numpy_convention())
    out = pl.pallas_call(
        kernel,
        out_shape=jax.ShapeDtypeStruct((bc_pad, n_pad), dtype),
        grid_spec=pltpu.PrefetchScalarGridSpec(
            num_scalar_prefetch=0,
            grid=grid,
            in_specs=[spec, spec],
            out_specs=spec,
        ),
        compiler_params=pltpu.CompilerParams(
            dimension_semantics=("parallel",),
            vmem_limit_bytes=vmem_limit,
        ),
    )(content_flat, style_flat)

    if pad_rows or pad_lanes:
        out = out[:bc, :n]
    return out


# Gradient semantics of `content + (... - content).detach()`:
#   d out / d content = identity, d out / d style = 0.
@jax.custom_vjp
def _efdm_match(content_flat, style_flat):
    return _efdm_pallas(content_flat, style_flat)


def _efdm_match_fwd(content_flat, style_flat):
    return _efdm_pallas(content_flat, style_flat), None


def _efdm_match_bwd(_, g):
    return g, jnp.zeros_like(g)


_efdm_match.defvjp(_efdm_match_fwd, _efdm_match_bwd)


def efdm_forward(x, key, *, p=1.0, training=True):
    """EFDM.forward: x is NCHW (B, C, W, H). With p=1.0 the transform always applies."""
    if not training:
        return x
    # random.random() > p is always False for p == 1.0, so the transform runs.
    # TODO(synk): for 0 < p < 1 the per-call Bernoulli skip is a host-side decision.
    B, C, W, H = x.shape
    k_perm, k_noise = jax.random.split(key)

    # style = Normal(1.0, 0.1) noise * x[randperm(B)]   (x.detach() path in PyTorch)
    perm = jax.random.permutation(k_perm, B)
    style = x[perm]
    noise_weight = 1.0 + 0.1 * jax.random.normal(k_noise, (B, C, W, H), dtype=x.dtype)
    style = noise_weight * style

    n = W * H
    out_flat = _efdm_match(x.reshape(B * C, n), style.reshape(B * C, n))
    return out_flat.reshape(B, C, W, H)


def _efdm_reference(content_flat, style_flat):
    """Pure-JAX reference of the PyTorch sort/argsort/gather semantics."""
    index_content = jnp.argsort(content_flat, axis=-1)
    value_style = jnp.sort(style_flat, axis=-1)
    inverse_index = jnp.argsort(index_content, axis=-1)
    gathered = jnp.take_along_axis(value_style, inverse_index, axis=-1)
    return content_flat + (gathered - content_flat)


if __name__ == "__main__":
    key = jax.random.PRNGKey(0)
    k_x, k_fwd = jax.random.split(key)

    B, C, W, H = 2, 4, 16, 16                 # small NCHW input, W*H = 256
    x = jax.random.normal(k_x, (B, C, W, H), dtype=jnp.float32)

    out = efdm_forward(x, k_fwd, p=1.0, training=True)
    out = jax.block_until_ready(out)

    # cross-check against a pure-JAX reference of the same forward
    k_perm, k_noise = jax.random.split(k_fwd)
    perm = jax.random.permutation(k_perm, B)
    style = (1.0 + 0.1 * jax.random.normal(k_noise, (B, C, W, H), dtype=x.dtype)) * x[perm]
    ref = _efdm_reference(x.reshape(B * C, W * H),
                          style.reshape(B * C, W * H)).reshape(B, C, W, H)
    assert jnp.allclose(out, ref, atol=1e-5, rtol=1e-5), "mismatch vs reference"

    print("KERNEL_OK")
</pallas_src>

<mosaic_0001>
module attributes {stable_mosaic.version = 11 : i64} {
  func.func @probe(%arg0: memref<8x128xi32, #tpu.memory_space<vmem>>, %arg1: memref<8x128xi32, #tpu.memory_space<vmem>>) attributes {dimension_semantics = [], scalar_prefetch = 0 : i64, scratch_operands = 0 : i64, tpu.core_type = #tpu.core_type<tc>} {
    %c0 = arith.constant 0 : index
    %c0_0 = arith.constant 0 : index
    %0 = vector.load %arg0[%c0, %c0_0] : memref<8x128xi32, #tpu.memory_space<vmem>>, vector<8x128xi32>
    %c1_i32 = arith.constant 1 : i32
    %1 = tpu.dynamic_rotate %0 by %c1_i32 dim 1 : vector<8x128xi32>, i32 -> vector<8x128xi32>
    %c0_1 = arith.constant 0 : index
    %c0_2 = arith.constant 0 : index
    %2 = vector.load %arg1[%c0_1, %c0_2] : memref<8x128xi32, #tpu.memory_space<vmem>>, vector<8x128xi32>
    tpu.vector_store %arg1[%c0_1, %c0_2], %1 {strides = array<i32>} : memref<8x128xi32, #tpu.memory_space<vmem>>, vector<8x128xi32>,
    return
  }
}

</mosaic_0001>

<bundles_post_ra>
// kernel: tpu_custom_call.1
= control target key start
LH: loop header
LB: loop body
LE: loop exit
PB: predicated region body
PF: predicated region fallthrough
CT: control target
= control target key end

     0   :  { %6 = vsyncpa [#allocation3], 0  ;;  %s118_s0 = inlined_call_operand.hbm [shape: s32[8,128], index: 0, kind: input, shape index: {}]   ;;  %s119_s1 = inlined_call_operand.hbm [shape: s32[8,128], index: 1, kind: output, shape index: {}]  }
   0x1   :  { %7 = vsyncpa [#allocation4], 0  ;;  %s13_s8 = sshll.u32 %s118_s0, 4  ;;  %s99_s9 = smov [#allocation2]   ;;  %s14_s8 = int_to_ptr.hbm [resolvable:$true] %s13_s8 }
   0x2   :  { %s15_s10 = sshll.u32 %s99_s9, 4  ;;  %s16_s10 = int_to_ptr.vmem [resolvable:$true] %s15_s10 }
   0x3   :  { %18 = dma.hbm_to_vmem [thread:$0]  %s14_s8, 128, %s16_s10, [#allocation3]  }
   0x4   :  { %95 = dma.done.wait [#allocation3], 128  }
   0x5   :  { %96 = vsyncadd [#allocation3], 4294967168  ;;  %v23_v0 = vld [vmem:[#allocation2] sm:$0xff]  ;;  %s100_s11 = smov 1   ;;  %s101_s12 = smov [#allocation5]  }
   0x6   :  { %24 = vrot.lane.b32.xlu0 %v23_v0, %s100_s11  ;;  %s32_s13 = sshll.u32 %s101_s12, 4  ;;  %s34_s16 = sshll.u32 %s119_s1, 4  ;;  %s33_s13 = int_to_ptr.vmem [resolvable:$true] %s32_s13  ;;  %s35_s16 = int_to_ptr.hbm [resolvable:$true] %s34_s16 }
  0x78   :  { %v25_v1 = vpop.permute.xlu0 %24 }
  0x79   :  { %26 = vst [vmem:[#allocation5] sm:$0xff] %v25_v1 }
  0x7a   :  { %37 = dma.vmem_to_hbm [thread:$0]  %s33_s13, 128, %s35_s16, [#allocation4]  }
  0x7b   :  { %97 = dma.done.wait [#allocation4], 128  }
  0x7c   :  { %98 = vsyncadd [#allocation4], 4294967168 }
  0x7d   :  { %42 = vsyncpa [#allocation3], 1 }
  0x7e   :  { %43 = vsyncpa [#allocation4], 1 }

</bundles_post_ra>
